<compile_context>
chip_gen: v6e
topology: v6e:2x2x1
jax: 0.10.0
libtpu: 0.0.40
codegen_flags: <defaults>
</compile_context>

<pallas_src>
import functools

import jax
import jax.numpy as jnp
from jax.experimental import pallas as pl
from jax.experimental.pallas import tpu as pltpu


def _gn_forward_kernel(umeas_ref, jmat_ref, sigma_ref, *, n_iter, back_cond):
    """Entire forward pass in one invocation (no grid).

    umeas_ref : (B, M)  boundary measurements
    jmat_ref  : (M, N)  linearized GN sensitivity matrix J
    sigma_ref : (B, N)  output conductivity
    """
    umeas = umeas_ref[...]            # (B, M)
    jmat = jmat_ref[...]              # (M, N)
    # One-time XLU transpose, hoisted out of the iteration loop, so that every
    # per-iteration contraction below is a standard (dim1 x dim0) MXU matmul.
    jmat_t = jnp.transpose(jmat)      # (N, M)

    # sigma = ones(B, N) * backCond  (initialized in-kernel; no sigma0 input DMA)
    sigma0 = jnp.full(sigma_ref.shape, back_cond, dtype=jnp.float32)

    def body(_, sigma):
        # delta_sigma = (Umeas - sigma @ J^T) @ J   (unfused, matches reference)
        resid = umeas - jnp.dot(sigma, jmat_t,
                                preferred_element_type=jnp.float32)     # (B, M)
        delta = jnp.dot(resid, jmat,
                        preferred_element_type=jnp.float32)             # (B, N)
        return sigma + 0.2 * delta

    # Iterations are serially dependent; fully unroll only when short.
    sigma = jax.lax.fori_loop(0, n_iter, body, sigma0,
                              unroll=bool(n_iter <= 8))

    # Single write of the final result.
    sigma_ref[...] = sigma


def graph_naive_iterative_net_forward(Umeas, jmat, back_cond, n_iter):
    """Pallas implementation of GraphNaiveIterativeNet.forward."""
    Umeas = Umeas.astype(jnp.float32)
    jmat = jmat.astype(jnp.float32)
    B, M = Umeas.shape
    Mj, N = jmat.shape
    assert M == Mj

    # Unfused loop: 2 matmuls (each 2*B*M*N flops) per iteration.
    flops = int(n_iter * 4 * B * M * N)
    bytes_accessed = int(4 * (B * M + M * N + B * N))

    kernel = functools.partial(_gn_forward_kernel,
                               n_iter=int(n_iter),
                               back_cond=float(back_cond))

    return pl.pallas_call(
        kernel,
        out_shape=jax.ShapeDtypeStruct((B, N), jnp.float32),
        in_specs=[
            pl.BlockSpec(memory_space=pltpu.MemorySpace.VMEM),  # Umeas (B, M)
            pl.BlockSpec(memory_space=pltpu.MemorySpace.VMEM),  # J     (M, N)
        ],
        out_specs=pl.BlockSpec(memory_space=pltpu.MemorySpace.VMEM),
        cost_estimate=pl.CostEstimate(flops=flops,
                                      transcendentals=0,
                                      bytes_accessed=bytes_accessed),
    )(Umeas, jmat)


def _reference_forward(Umeas, jmat, back_cond, n_iter):
    """Pure-JAX reference (original unfused two-matmul form)."""
    B = Umeas.shape[0]
    N = jmat.shape[1]
    sigma = jnp.ones((B, N), jnp.float32) * back_cond
    for _ in range(n_iter):
        resid = Umeas - sigma @ jmat.T
        delta = resid @ jmat
        sigma = sigma + 0.2 * delta
    return sigma


if __name__ == "__main__":
    key = jax.random.PRNGKey(0)
    k_j, k_u = jax.random.split(key)

    n_dof = 256     # number of FEM dofs in V_sigma (synthetic, toy size)
    n_meas = 128    # number of EIT boundary measurements (synthetic)
    n_iter = 5
    back_cond = 1.0

    # Fixed linearized sensitivity matrix standing in for the FEM GN solver.
    jmat = 0.05 * jax.random.normal(k_j, (n_meas, n_dof), jnp.float32)
    # forward() hard-codes sigma batch = 1 (torch.ones(1, N)); Umeas matches.
    Umeas = jax.random.normal(k_u, (1, n_meas), jnp.float32)

    sigma = graph_naive_iterative_net_forward(Umeas, jmat, back_cond, n_iter)
    sigma = jax.block_until_ready(sigma)

    ref = _reference_forward(Umeas, jmat, back_cond, n_iter)
    assert sigma.shape == (1, n_dof)
    assert sigma.dtype == jnp.float32
    assert jnp.allclose(sigma, ref, atol=1e-4, rtol=1e-4)
    print("KERNEL_OK")
</pallas_src>

<mosaic_0001>
module attributes {stable_mosaic.version = 11 : i64} {
  func.func @_gn_forward_kernel(%arg0: memref<1x128xf32, #tpu.memory_space<vmem>>, %arg1: memref<128x256xf32, #tpu.memory_space<vmem>>, %arg2: memref<1x256xf32, #tpu.memory_space<vmem>>) attributes {dimension_semantics = [], scalar_prefetch = 0 : i64, scratch_operands = 0 : i64, tpu.core_type = #tpu.core_type<tc>} {
    %c0 = arith.constant 0 : index
    %c0_0 = arith.constant 0 : index
    %0 = vector.load %arg0[%c0, %c0_0] : memref<1x128xf32, #tpu.memory_space<vmem>>, vector<1x128xf32>
    %c0_1 = arith.constant 0 : index
    %c0_2 = arith.constant 0 : index
    %1 = vector.load %arg1[%c0_1, %c0_2] : memref<128x256xf32, #tpu.memory_space<vmem>>, vector<128x256xf32>
    %2 = tpu.transpose %1, [1, 0] : vector<128x256xf32> -> vector<256x128xf32>
    %cst = arith.constant 1.000000e+00 : f32
    %3 = vector.broadcast %cst : f32 to vector<1x256xf32>
    %c0_i32 = arith.constant 0 : i32
    %cst_3 = arith.constant dense<0.000000e+00> : vector<1x128xf32>
    %4 = tpu.matmul %3, %2, %cst_3 {dimension_numbers = #tpu.dot_dimension_numbers<[1], [0], [0], [1], [0, 0, 1, 1], [], []>} : vector<1x256xf32>, vector<256x128xf32>, vector<1x128xf32> -> vector<1x128xf32>
    %5 = arith.subf %0, %4 : vector<1x128xf32>
    %cst_4 = arith.constant dense<0.000000e+00> : vector<1x256xf32>
    %6 = tpu.matmul %5, %1, %cst_4 {dimension_numbers = #tpu.dot_dimension_numbers<[1], [0], [0], [1], [0, 0, 1, 1], [], []>} : vector<1x128xf32>, vector<128x256xf32>, vector<1x256xf32> -> vector<1x256xf32>
    %cst_5 = arith.constant 2.000000e-01 : f32
    %7 = vector.broadcast %cst_5 : f32 to vector<1x256xf32>
    %8 = arith.mulf %7, %6 : vector<1x256xf32>
    %9 = arith.addf %3, %8 : vector<1x256xf32>
    %c1_i32 = arith.constant 1 : i32
    %cst_6 = arith.constant dense<0.000000e+00> : vector<1x128xf32>
    %10 = tpu.matmul %9, %2, %cst_6 {dimension_numbers = #tpu.dot_dimension_numbers<[1], [0], [0], [1], [0, 0, 1, 1], [], []>} : vector<1x256xf32>, vector<256x128xf32>, vector<1x128xf32> -> vector<1x128xf32>
    %11 = arith.subf %0, %10 : vector<1x128xf32>
    %cst_7 = arith.constant dense<0.000000e+00> : vector<1x256xf32>
    %12 = tpu.matmul %11, %1, %cst_7 {dimension_numbers = #tpu.dot_dimension_numbers<[1], [0], [0], [1], [0, 0, 1, 1], [], []>} : vector<1x128xf32>, vector<128x256xf32>, vector<1x256xf32> -> vector<1x256xf32>
    %cst_8 = arith.constant 2.000000e-01 : f32
    %13 = vector.broadcast %cst_8 : f32 to vector<1x256xf32>
    %14 = arith.mulf %13, %12 : vector<1x256xf32>
    %15 = arith.addf %9, %14 : vector<1x256xf32>
    %c2_i32 = arith.constant 2 : i32
    %cst_9 = arith.constant dense<0.000000e+00> : vector<1x128xf32>
    %16 = tpu.matmul %15, %2, %cst_9 {dimension_numbers = #tpu.dot_dimension_numbers<[1], [0], [0], [1], [0, 0, 1, 1], [], []>} : vector<1x256xf32>, vector<256x128xf32>, vector<1x128xf32> -> vector<1x128xf32>
    %17 = arith.subf %0, %16 : vector<1x128xf32>
    %cst_10 = arith.constant dense<0.000000e+00> : vector<1x256xf32>
    %18 = tpu.matmul %17, %1, %cst_10 {dimension_numbers = #tpu.dot_dimension_numbers<[1], [0], [0], [1], [0, 0, 1, 1], [], []>} : vector<1x128xf32>, vector<128x256xf32>, vector<1x256xf32> -> vector<1x256xf32>
    %cst_11 = arith.constant 2.000000e-01 : f32
    %19 = vector.broadcast %cst_11 : f32 to vector<1x256xf32>
    %20 = arith.mulf %19, %18 : vector<1x256xf32>
    %21 = arith.addf %15, %20 : vector<1x256xf32>
    %c3_i32 = arith.constant 3 : i32
    %cst_12 = arith.constant dense<0.000000e+00> : vector<1x128xf32>
    %22 = tpu.matmul %21, %2, %cst_12 {dimension_numbers = #tpu.dot_dimension_numbers<[1], [0], [0], [1], [0, 0, 1, 1], [], []>} : vector<1x256xf32>, vector<256x128xf32>, vector<1x128xf32> -> vector<1x128xf32>
    %23 = arith.subf %0, %22 : vector<1x128xf32>
    %cst_13 = arith.constant dense<0.000000e+00> : vector<1x256xf32>
    %24 = tpu.matmul %23, %1, %cst_13 {dimension_numbers = #tpu.dot_dimension_numbers<[1], [0], [0], [1], [0, 0, 1, 1], [], []>} : vector<1x128xf32>, vector<128x256xf32>, vector<1x256xf32> -> vector<1x256xf32>
    %cst_14 = arith.constant 2.000000e-01 : f32
    %25 = vector.broadcast %cst_14 : f32 to vector<1x256xf32>
    %26 = arith.mulf %25, %24 : vector<1x256xf32>
    %27 = arith.addf %21, %26 : vector<1x256xf32>
    %c4_i32 = arith.constant 4 : i32
    %cst_15 = arith.constant dense<0.000000e+00> : vector<1x128xf32>
    %28 = tpu.matmul %27, %2, %cst_15 {dimension_numbers = #tpu.dot_dimension_numbers<[1], [0], [0], [1], [0, 0, 1, 1], [], []>} : vector<1x256xf32>, vector<256x128xf32>, vector<1x128xf32> -> vector<1x128xf32>
    %29 = arith.subf %0, %28 : vector<1x128xf32>
    %cst_16 = arith.constant dense<0.000000e+00> : vector<1x256xf32>
    %30 = tpu.matmul %29, %1, %cst_16 {dimension_numbers = #tpu.dot_dimension_numbers<[1], [0], [0], [1], [0, 0, 1, 1], [], []>} : vector<1x128xf32>, vector<128x256xf32>, vector<1x256xf32> -> vector<1x256xf32>
    %cst_17 = arith.constant 2.000000e-01 : f32
    %31 = vector.broadcast %cst_17 : f32 to vector<1x256xf32>
    %32 = arith.mulf %31, %30 : vector<1x256xf32>
    %33 = arith.addf %27, %32 : vector<1x256xf32>
    %c0_18 = arith.constant 0 : index
    %c0_19 = arith.constant 0 : index
    %34 = vector.load %arg2[%c0_18, %c0_19] : memref<1x256xf32, #tpu.memory_space<vmem>>, vector<1x256xf32>
    tpu.vector_store %arg2[%c0_18, %c0_19], %33 {strides = array<i32>} : memref<1x256xf32, #tpu.memory_space<vmem>>, vector<1x256xf32>,
    return
  }
}

</mosaic_0001>

<bundles_post_ra>
// kernel: tpu_custom_call.1
= control target key start
LH: loop header
LB: loop body
LE: loop exit
PB: predicated region body
PF: predicated region fallthrough
CT: control target
= control target key end

     0   :  { %7 = vsyncpa [#allocation3], 0  ;;  %s1368_s0 = inlined_call_operand.hbm [shape: f32[1,128], index: 0, kind: input, shape index: {}]   ;;  %s1369_s1 = inlined_call_operand.hbm [shape: f32[128,256], index: 1, kind: input, shape index: {}]   ;;  %s1370_s2 = inlined_call_operand.hbm [shape: f32[1,256], index: 2, kind: output, shape index: {}]  }
   0x1   :  { %8 = vsyncpa [#allocation6], 0 }
   0x2   :  { %9 = vsyncpa [#allocation4], 0  ;;  %s914_s9 = smov [#allocation2]   ;;  %s915_s11 = smov [#allocation5]  }
   0x3   :  { %s16_s10 = sshll.u32 %s914_s9, 4  ;;  %s25_s12 = sshll.u32 %s915_s11, 4  ;;  %s17_s10 = int_to_ptr.vmem [resolvable:$true] %s16_s10  ;;  %s26_s12 = int_to_ptr.vmem [resolvable:$true] %s25_s12 }
   0x4   :  { %s856_s13 = scalar_lea.vmem %s17_s10, 16  ;;  %s860_s14 = scalar_lea.vmem %s17_s10, 32 }
   0x5   :  { %p857_p0 = scmp.ne.s32.totalorder %s17_s10, %s856_s13  ;;  %p861_p1 = scmp.lt.s32.totalorder %s17_s10, %s17_s10 }
   0x6   :  { %p862_p2 = scmp.lt.s32.totalorder %s860_s14, %s856_s13 }
   0x8   :  { %p863_p3 = por %p862_p2, %p861_p1 }
   0xa   :  { %p864_p4 = pnand %p863_p3, %p857_p0 }
   0xc   :  { %867 = shalt.err (!%p864_p4)
}
   0xd   :  { %19 = dma.hbm_to_vmem [thread:$0]  %s1368_s0, 16, %s17_s10, [#allocation3]  }
   0xe   :  { %s876_s17 = scalar_lea.vmem %s26_s12, 4096  ;;  %p881_p6 = scmp.lt.s32.totalorder %s26_s12, %s26_s12 }
   0xf   :  { %p877_p5 = scmp.ne.s32.totalorder %s26_s12, %s876_s17  ;;  %p882_p7 = scmp.lt.s32.totalorder %s876_s17, %s876_s17 }
  0x11   :  { %p883_p8 = por %p882_p7, %p881_p6 }
  0x13   :  { %p884_p9 = pnand %p883_p8, %p877_p5 }
  0x15   :  { %887 = shalt.err (!%p884_p9)
}
  0x16   :  { %s916_s18 = smov 256   ;;  %s917_s19 = smov 16  }
  0x17   :  { %31 = dma.hbm_to_vmem [thread:$0]  %s1369_s1, 4096, %s26_s12, [#allocation6], %s916_s18, %s916_s18, %s917_s19  }
  0x18   :  { %908 = dma.done.wait [#allocation3], 16  }
  0x19   :  { %909 = vsyncadd [#allocation3], 4294967280 }
  0x1a   :  { %910 = dma.done.wait [#allocation6], 4096  }
  0x1b   :  { %911 = vsyncadd [#allocation6], 4294963200  ;;  %v918_v0 = vmov 1.0   ;;  %v944_v1 = vld [vmem:[#allocation5 + $0xf8] sm:$0xff]  ;;  %v946_v2 = vld [vmem:[#allocation5 + $0xf0] sm:$0xff]  ;;  %v919_v33 = vmov 0.0  }
  0x1c   :  { %135 = vmatprep.mubr.f32.mxu0 %v918_v0  ;;  %v948_v3 = vld [vmem:[#allocation5 + $0xe8] sm:$0xff]  ;;  %71 = vmatprep.subr.mxu0 %v944_v1  ;;  %v955_v4 = vld [vmem:[#allocation5 + $0xe0] sm:$0xff]  ;;  %v958_v5 = vld [vmem:[#allocation5 + $0xd8] sm:$0xff]  ;;  %s921_s0 = smov [#allocation7]  }
  0x1d   :  { %142 = vmatprep.subr.mxu1 %v944_v1  ;;  %72 = vmatpush1.xpose.msra.mxu0 %v946_v2  ;;  %v961_v6 = vld [vmem:[#allocation5 + $0xd0] sm:$0xff]  ;;  %v965_v7 = vld [vmem:[#allocation5 + $0xc8] sm:$0xff]  ;;  %v969_v8 = vld [vmem:[#allocation5 + $0xc0] sm:$0xff]  ;;  %s830_s1 = sshll.u32 %s921_s0, 4  ;;  %s831_s1 = int_to_ptr.vmem [resolvable:$true] %s830_s1 }
  0x1e   :  { %143 = vmatpush1.msra.mxu1 %v946_v2  ;;  %73 = vmatprep.subr.mxu0 %v948_v3  ;;  %v972_v9 = vld [vmem:[#allocation5 + $0xb8] sm:$0xff]  ;;  %v975_v10 = vld [vmem:[#allocation5 + $0xb0] sm:$0xff]  ;;  %v979_v11 = vld [vmem:[#allocation5 + $0xa8] sm:$0xff]  ;;  %s888_s22 = scalar_lea.vmem %s831_s1, 32  ;;  %p893_p11 = scmp.lt.s32.totalorder %s831_s1, %s831_s1 }
  0x1f   :  { %144 = vmatprep.subr.mxu1 %v948_v3  ;;  %v983_v12 = vld [vmem:[#allocation5 + $0xa0] sm:$0xff]  ;;  %v986_v13 = vld [vmem:[#allocation5 + $0x98] sm:$0xff]  ;;  %v989_v14 = vld [vmem:[#allocation5 + $0x90] sm:$0xff]  ;;  %206 = vmatprep.mubr.f32.mxu1 %v919_v33  ;;  %p889_p10 = scmp.ne.s32.totalorder %s831_s1, %s888_s22  ;;  %p894_p12 = scmp.lt.s32.totalorder %s888_s22, %s888_s22 }
  0x20   :  { %145 = vmatpush1.msra.mxu1 %v955_v4  ;;  %v993_v15 = vld [vmem:[#allocation5 + $0x88] sm:$0xff]  ;;  %v997_v16 = vld [vmem:[#allocation5 + $0x80] sm:$0xff]  ;;  %v1000_v17 = vld [vmem:[#allocation5 + $0x78] sm:$0xff] }
  0x21   :  { %146 = vmatprep.subr.mxu1 %v958_v5  ;;  %74 = vmatpush1.xpose.msra.mxu0 %v955_v4  ;;  %v1003_v18 = vld [vmem:[#allocation5 + $0x70] sm:$0xff]  ;;  %v1007_v19 = vld [vmem:[#allocation5 + $0x68] sm:$0xff]  ;;  %v1011_v20 = vld [vmem:[#allocation5 + $0x60] sm:$0xff]  ;;  %p895_p13 = por %p894_p12, %p893_p11 }
  0x22   :  { %147 = vmatpush1.msra.mxu1 %v961_v6  ;;  %75 = vmatprep.subr.mxu0 %v958_v5  ;;  %v1014_v21 = vld [vmem:[#allocation5 + $0x58] sm:$0xff]  ;;  %v1017_v22 = vld [vmem:[#allocation5 + $0x50] sm:$0xff]  ;;  %v1021_v23 = vld [vmem:[#allocation5 + $0x48] sm:$0xff] }
  0x23   :  { %148 = vmatprep.subr.mxu1 %v965_v7  ;;  %v1025_v24 = vld [vmem:[#allocation5 + $0x40] sm:$0xff]  ;;  %v1028_v25 = vld [vmem:[#allocation5 + $0x38] sm:$0xff]  ;;  %v1031_v26 = vld [vmem:[#allocation5 + $0x30] sm:$0xff]  ;;  %p896_p0 = pnand %p895_p13, %p889_p10 }
  0x24   :  { %149 = vmatpush1.msra.mxu1 %v969_v8  ;;  %v1035_v27 = vld [vmem:[#allocation5 + $0x28] sm:$0xff]  ;;  %v1039_v28 = vld [vmem:[#allocation5 + $0x20] sm:$0xff]  ;;  %v1042_v29 = vld [vmem:[#allocation5 + $0x18] sm:$0xff] }
  0x25   :  { %150 = vmatprep.subr.mxu1 %v972_v9  ;;  %76 = vmatpush1.xpose.msra.mxu0 %v961_v6  ;;  %v1045_v30 = vld [vmem:[#allocation5 + $0x10] sm:$0xff]  ;;  %v1049_v31 = vld [vmem:[#allocation5 + $0x8] sm:$0xff]  ;;  %v1053_v32 = vld [vmem:[#allocation5] sm:$0xff] }
  0x26   :  { %151 = vmatpush1.msra.mxu1 %v975_v10  ;;  %77 = vmatprep.subr.mxu0 %v965_v7  ;;  %v1109_v34 = vld [vmem:[#allocation2] sm:$0x1] }
  0x27   :  { %152 = vmatprep.subr.mxu1 %v979_v11 }
  0x28   :  { %153 = vmatpush1.msra.mxu1 %v983_v12 }
  0x29   :  { %154 = vmatprep.subr.mxu1 %v986_v13  ;;  %78 = vmatpush1.xpose.msra.mxu0 %v969_v8 }
  0x2a   :  { %155 = vmatpush1.msra.mxu1 %v989_v14  ;;  %79 = vmatprep.subr.mxu0 %v972_v9 }
  0x2b   :  { %156 = vmatprep.subr.mxu1 %v993_v15 }
  0x2c   :  { %157 = vmatpush1.msra.mxu1 %v997_v16 }
  0x2d   :  { %158 = vmatprep.subr.mxu1 %v1000_v17  ;;  %80 = vmatpush1.xpose.msra.mxu0 %v975_v10 }
  0x2e   :  { %159 = vmatpush1.msra.mxu1 %v1003_v18  ;;  %81 = vmatprep.subr.mxu0 %v979_v11 }
  0x2f   :  { %160 = vmatprep.subr.mxu1 %v1007_v19 }
  0x30   :  { %161 = vmatpush1.msra.mxu1 %v1011_v20 }
  0x31   :  { %162 = vmatprep.subr.mxu1 %v1014_v21  ;;  %82 = vmatpush1.xpose.msra.mxu0 %v983_v12 }
  0x32   :  { %163 = vmatpush1.msra.mxu1 %v1017_v22  ;;  %83 = vmatprep.subr.mxu0 %v986_v13 }
  0x33   :  { %164 = vmatprep.subr.mxu1 %v1021_v23 }
  0x34   :  { %165 = vmatpush1.msra.mxu1 %v1025_v24 }
  0x35   :  { %166 = vmatprep.subr.mxu1 %v1028_v25  ;;  %84 = vmatpush1.xpose.msra.mxu0 %v989_v14 }
  0x36   :  { %167 = vmatpush1.msra.mxu1 %v1031_v26  ;;  %85 = vmatprep.subr.mxu0 %v993_v15 }
  0x37   :  { %168 = vmatprep.subr.mxu1 %v1035_v27 }
  0x38   :  { %169 = vmatpush1.msra.mxu1 %v1039_v28 }
  0x39   :  { %170 = vmatprep.subr.mxu1 %v1042_v29  ;;  %86 = vmatpush1.xpose.msra.mxu0 %v997_v16 }
  0x3a   :  { %171 = vmatpush1.msra.mxu1 %v1045_v30  ;;  %87 = vmatprep.subr.mxu0 %v1000_v17 }
  0x3b   :  { %172 = vmatprep.subr.mxu1 %v1049_v31 }
  0x3c   :  { %173 = vmatpush1.msra.mxu1 %v1053_v32 }
  0x3d   :  { %217 = vmatprep.subr.mxu1 %v944_v1  ;;  %88 = vmatpush1.xpose.msra.mxu0 %v1003_v18 }
  0x3e   :  { %89 = vmatprep.subr.mxu0 %v1007_v19 }
  0x41   :  { %90 = vmatpush1.xpose.msra.mxu0 %v1011_v20 }
  0x42   :  { %91 = vmatprep.subr.mxu0 %v1014_v21 }
  0x45   :  { %92 = vmatpush1.xpose.msra.mxu0 %v1017_v22 }
  0x46   :  { %93 = vmatprep.subr.mxu0 %v1021_v23 }
  0x49   :  { %94 = vmatpush1.xpose.msra.mxu0 %v1025_v24 }
  0x4a   :  { %95 = vmatprep.subr.mxu0 %v1028_v25 }
  0x4d   :  { %96 = vmatpush1.xpose.msra.mxu0 %v1031_v26 }
  0x4e   :  { %97 = vmatprep.subr.mxu0 %v1035_v27 }
  0x51   :  { %98 = vmatpush1.xpose.msra.mxu0 %v1039_v28 }
  0x52   :  { %99 = vmatprep.subr.mxu0 %v1042_v29 }
  0x55   :  { %100 = vmatpush1.xpose.msra.mxu0 %v1045_v30 }
  0x56   :  { %101 = vmatprep.subr.mxu0 %v1049_v31 }
  0x59   :  { %102 = vmatpush1.xpose.msra.mxu0 %v1053_v32 }
  0x5a   :  { %288 = vmatprep.subr.mxu0 %v944_v1 }
  0x5c   :  { %136 = vmatmul.mubr.f32.vlgmr.msra.gmra.mxu0 %v918_v0 }
  0x5d   :  { %289 = vmatpush1.msra.mxu0 %v946_v2  ;;  %352 = vmatprep.mubr.f32.mxu0 %v919_v33 }
  0x5e   :  { %290 = vmatprep.subr.mxu0 %v948_v3 }
  0x5f   :  { %291 = vmatpush1.msra.mxu0 %v955_v4 }
  0x60   :  { %292 = vmatprep.subr.mxu0 %v958_v5 }
  0x61   :  { %293 = vmatpush1.msra.mxu0 %v961_v6 }
  0x62   :  { %294 = vmatprep.subr.mxu0 %v965_v7 }
  0x63   :  { %295 = vmatpush1.msra.mxu0 %v969_v8 }
  0x64   :  { %296 = vmatprep.subr.mxu0 %v972_v9 }
  0x65   :  { %297 = vmatpush1.msra.mxu0 %v975_v10 }
  0x66   :  { %298 = vmatprep.subr.mxu0 %v979_v11 }
  0x67   :  { %299 = vmatpush1.msra.mxu0 %v983_v12 }
  0x68   :  { %300 = vmatprep.subr.mxu0 %v986_v13 }
  0x69   :  { %301 = vmatpush1.msra.mxu0 %v989_v14 }
  0x6a   :  { %302 = vmatprep.subr.mxu0 %v993_v15 }
  0x6b   :  { %303 = vmatpush1.msra.mxu0 %v997_v16 }
  0x6c   :  { %304 = vmatprep.subr.mxu0 %v1000_v17 }
  0x6d   :  { %305 = vmatpush1.msra.mxu0 %v1003_v18 }
  0x6e   :  { %306 = vmatprep.subr.mxu0 %v1007_v19 }
  0x6f   :  { %307 = vmatpush1.msra.mxu0 %v1011_v20 }
  0x70   :  { %308 = vmatprep.subr.mxu0 %v1014_v21 }
  0x71   :  { %309 = vmatpush1.msra.mxu0 %v1017_v22 }
  0x72   :  { %310 = vmatprep.subr.mxu0 %v1021_v23 }
  0x73   :  { %311 = vmatpush1.msra.mxu0 %v1025_v24 }
  0x74   :  { %312 = vmatprep.subr.mxu0 %v1028_v25 }
  0x75   :  { %313 = vmatpush1.msra.mxu0 %v1031_v26 }
  0x76   :  { %314 = vmatprep.subr.mxu0 %v1035_v27 }
  0x77   :  { %315 = vmatpush1.msra.mxu0 %v1039_v28 }
  0x78   :  { %316 = vmatprep.subr.mxu0 %v1042_v29 }
  0x79   :  { %317 = vmatpush1.msra.mxu0 %v1045_v30 }
  0x7a   :  { %318 = vmatprep.subr.mxu0 %v1049_v31 }
  0x7b   :  { %319 = vmatpush1.msra.mxu0 %v1053_v32 }
  0x7c   :  { %363 = vmatprep.subr.mxu0 %v944_v1 }
 0x11c   :  { %v137_v35 = vpop.f32.mrf.mxu0 }
 0x11d   :  { %v141_v36 = vsub.f32 %v1109_v34, %v137_v35 }
 0x11e   :  { %v139_v37 = vpop.f32.mrf.mxu0 }
 0x11f   :  { %207 = vmatmul.mubr.f32.vlgmr.msra.gmra.mxu1 %v141_v36 }
 0x120   :  { %218 = vmatpush1.xpose.msra.mxu1 %v946_v2 }
 0x121   :  { %219 = vmatprep.subr.mxu1 %v948_v3 }
 0x124   :  { %220 = vmatpush1.xpose.msra.mxu1 %v955_v4 }
 0x125   :  { %221 = vmatprep.subr.mxu1 %v958_v5 }
 0x128   :  { %222 = vmatpush1.xpose.msra.mxu1 %v961_v6 }
 0x129   :  { %223 = vmatprep.subr.mxu1 %v965_v7 }
 0x12c   :  { %224 = vmatpush1.xpose.msra.mxu1 %v969_v8 }
 0x12d   :  { %225 = vmatprep.subr.mxu1 %v972_v9 }
 0x130   :  { %226 = vmatpush1.xpose.msra.mxu1 %v975_v10 }
 0x131   :  { %227 = vmatprep.subr.mxu1 %v979_v11 }
 0x134   :  { %228 = vmatpush1.xpose.msra.mxu1 %v983_v12 }
 0x135   :  { %229 = vmatprep.subr.mxu1 %v986_v13 }
 0x138   :  { %230 = vmatpush1.xpose.msra.mxu1 %v989_v14 }
 0x139   :  { %231 = vmatprep.subr.mxu1 %v993_v15 }
 0x13c   :  { %232 = vmatpush1.xpose.msra.mxu1 %v997_v16 }
 0x13d   :  { %233 = vmatprep.subr.mxu1 %v1000_v17 }
 0x140   :  { %234 = vmatpush1.xpose.msra.mxu1 %v1003_v18 }
 0x141   :  { %235 = vmatprep.subr.mxu1 %v1007_v19 }
 0x144   :  { %236 = vmatpush1.xpose.msra.mxu1 %v1011_v20 }
 0x145   :  { %237 = vmatprep.subr.mxu1 %v1014_v21 }
 0x148   :  { %238 = vmatpush1.xpose.msra.mxu1 %v1017_v22 }
 0x149   :  { %239 = vmatprep.subr.mxu1 %v1021_v23 }
 0x14c   :  { %240 = vmatpush1.xpose.msra.mxu1 %v1025_v24 }
 0x14d   :  { %241 = vmatprep.subr.mxu1 %v1028_v25 }
 0x150   :  { %242 = vmatpush1.xpose.msra.mxu1 %v1031_v26 }
 0x151   :  { %243 = vmatprep.subr.mxu1 %v1035_v27 }
 0x154   :  { %244 = vmatpush1.xpose.msra.mxu1 %v1039_v28 }
 0x155   :  { %245 = vmatprep.subr.mxu1 %v1042_v29 }
 0x158   :  { %246 = vmatpush1.xpose.msra.mxu1 %v1045_v30 }
 0x159   :  { %247 = vmatprep.subr.mxu1 %v1049_v31 }
 0x15c   :  { %248 = vmatpush1.xpose.msra.mxu1 %v1053_v32 }
 0x15d   :  { %434 = vmatprep.subr.mxu1 %v944_v1 }
 0x1df   :  { %v208_v38 = vpop.f32.mrf.mxu1 }
 0x1e0   :  { %v213_v39 = vmul.f32 0.2, %v208_v38 }
 0x1e1   :  { %v210_v40 = vpop.f32.mrf.mxu1 }
 0x1e2   :  { %v214_v41 = vmul.f32 0.2, %v210_v40  ;;  %v1146_v43 = vadd.f32 1.0, %v213_v39 }
 0x1e4   :  { %v1144_v42 = vadd.f32 1.0, %v214_v41 }
 0x1e6   :  { %281 = vmatprep.mubr.f32.mxu1 %v1144_v42 }
 0x1e7   :  { %282 = vmatmul.mubr.f32.vlgmr.msra.gmra.mxu1 %v1146_v43 }
 0x1e8   :  { %435 = vmatpush1.msra.mxu1 %v946_v2  ;;  %498 = vmatprep.mubr.f32.mxu1 %v919_v33 }
 0x1e9   :  { %436 = vmatprep.subr.mxu1 %v948_v3 }
 0x1ea   :  { %437 = vmatpush1.msra.mxu1 %v955_v4 }
 0x1eb   :  { %438 = vmatprep.subr.mxu1 %v958_v5 }
 0x1ec   :  { %439 = vmatpush1.msra.mxu1 %v961_v6 }
 0x1ed   :  { %440 = vmatprep.subr.mxu1 %v965_v7 }
 0x1ee   :  { %441 = vmatpush1.msra.mxu1 %v969_v8 }
 0x1ef   :  { %442 = vmatprep.subr.mxu1 %v972_v9 }
 0x1f0   :  { %443 = vmatpush1.msra.mxu1 %v975_v10 }
 0x1f1   :  { %444 = vmatprep.subr.mxu1 %v979_v11 }
 0x1f2   :  { %445 = vmatpush1.msra.mxu1 %v983_v12 }
 0x1f3   :  { %446 = vmatprep.subr.mxu1 %v986_v13 }
 0x1f4   :  { %447 = vmatpush1.msra.mxu1 %v989_v14 }
 0x1f5   :  { %448 = vmatprep.subr.mxu1 %v993_v15 }
 0x1f6   :  { %449 = vmatpush1.msra.mxu1 %v997_v16 }
 0x1f7   :  { %450 = vmatprep.subr.mxu1 %v1000_v17 }
 0x1f8   :  { %451 = vmatpush1.msra.mxu1 %v1003_v18 }
 0x1f9   :  { %452 = vmatprep.subr.mxu1 %v1007_v19 }
 0x1fa   :  { %453 = vmatpush1.msra.mxu1 %v1011_v20 }
 0x1fb   :  { %454 = vmatprep.subr.mxu1 %v1014_v21 }
 0x1fc   :  { %455 = vmatpush1.msra.mxu1 %v1017_v22 }
 0x1fd   :  { %456 = vmatprep.subr.mxu1 %v1021_v23 }
 0x1fe   :  { %457 = vmatpush1.msra.mxu1 %v1025_v24 }
 0x1ff   :  { %458 = vmatprep.subr.mxu1 %v1028_v25 }
 0x200   :  { %459 = vmatpush1.msra.mxu1 %v1031_v26 }
 0x201   :  { %460 = vmatprep.subr.mxu1 %v1035_v27 }
 0x202   :  { %461 = vmatpush1.msra.mxu1 %v1039_v28 }
 0x203   :  { %462 = vmatprep.subr.mxu1 %v1042_v29 }
 0x204   :  { %463 = vmatpush1.msra.mxu1 %v1045_v30 }
 0x205   :  { %464 = vmatprep.subr.mxu1 %v1049_v31 }
 0x206   :  { %465 = vmatpush1.msra.mxu1 %v1053_v32 }
 0x207   :  { %509 = vmatprep.subr.mxu1 %v944_v1 }
 0x2a7   :  { %v283_v44 = vpop.f32.mrf.mxu1 }
 0x2a8   :  { %v287_v45 = vsub.f32 %v1109_v34, %v283_v44 }
 0x2a9   :  { %v285_v46 = vpop.f32.mrf.mxu1 }
 0x2aa   :  { %353 = vmatmul.mubr.f32.vlgmr.msra.gmra.mxu0 %v287_v45 }
 0x2ab   :  { %364 = vmatpush1.xpose.msra.mxu0 %v946_v2 }
 0x2ac   :  { %365 = vmatprep.subr.mxu0 %v948_v3 }
 0x2af   :  { %366 = vmatpush1.xpose.msra.mxu0 %v955_v4 }
 0x2b0   :  { %367 = vmatprep.subr.mxu0 %v958_v5 }
 0x2b3   :  { %368 = vmatpush1.xpose.msra.mxu0 %v961_v6 }
 0x2b4   :  { %369 = vmatprep.subr.mxu0 %v965_v7 }
 0x2b7   :  { %370 = vmatpush1.xpose.msra.mxu0 %v969_v8 }
 0x2b8   :  { %371 = vmatprep.subr.mxu0 %v972_v9 }
 0x2bb   :  { %372 = vmatpush1.xpose.msra.mxu0 %v975_v10 }
 0x2bc   :  { %373 = vmatprep.subr.mxu0 %v979_v11 }
 0x2bf   :  { %374 = vmatpush1.xpose.msra.mxu0 %v983_v12 }
 0x2c0   :  { %375 = vmatprep.subr.mxu0 %v986_v13 }
 0x2c3   :  { %376 = vmatpush1.xpose.msra.mxu0 %v989_v14 }
 0x2c4   :  { %377 = vmatprep.subr.mxu0 %v993_v15 }
 0x2c7   :  { %378 = vmatpush1.xpose.msra.mxu0 %v997_v16 }
 0x2c8   :  { %379 = vmatprep.subr.mxu0 %v1000_v17 }
 0x2cb   :  { %380 = vmatpush1.xpose.msra.mxu0 %v1003_v18 }
 0x2cc   :  { %381 = vmatprep.subr.mxu0 %v1007_v19 }
 0x2cf   :  { %382 = vmatpush1.xpose.msra.mxu0 %v1011_v20 }
 0x2d0   :  { %383 = vmatprep.subr.mxu0 %v1014_v21 }
 0x2d3   :  { %384 = vmatpush1.xpose.msra.mxu0 %v1017_v22 }
 0x2d4   :  { %385 = vmatprep.subr.mxu0 %v1021_v23 }
 0x2d7   :  { %386 = vmatpush1.xpose.msra.mxu0 %v1025_v24 }
 0x2d8   :  { %387 = vmatprep.subr.mxu0 %v1028_v25 }
 0x2db   :  { %388 = vmatpush1.xpose.msra.mxu0 %v1031_v26 }
 0x2dc   :  { %389 = vmatprep.subr.mxu0 %v1035_v27 }
 0x2df   :  { %390 = vmatpush1.xpose.msra.mxu0 %v1039_v28 }
 0x2e0   :  { %391 = vmatprep.subr.mxu0 %v1042_v29 }
 0x2e3   :  { %392 = vmatpush1.xpose.msra.mxu0 %v1045_v30 }
 0x2e4   :  { %393 = vmatprep.subr.mxu0 %v1049_v31 }
 0x2e7   :  { %394 = vmatpush1.xpose.msra.mxu0 %v1053_v32 }
 0x2e8   :  { %580 = vmatprep.subr.mxu0 %v944_v1 }
 0x36a   :  { %v354_v47 = vpop.f32.mrf.mxu0 }
 0x36b   :  { %v359_v48 = vmul.f32 0.2, %v354_v47 }
 0x36c   :  { %v356_v49 = vpop.f32.mrf.mxu0 }
 0x36d   :  { %v360_v50 = vmul.f32 0.2, %v356_v49  ;;  %v1220_v52 = vadd.f32 %v359_v48, %v1146_v43 }
 0x36f   :  { %v1217_v51 = vadd.f32 %v360_v50, %v1144_v42 }
 0x371   :  { %427 = vmatprep.mubr.f32.mxu0 %v1217_v51 }
 0x372   :  { %428 = vmatmul.mubr.f32.vlgmr.msra.gmra.mxu0 %v1220_v52 }
 0x373   :  { %581 = vmatpush1.msra.mxu0 %v946_v2  ;;  %644 = vmatprep.mubr.f32.mxu0 %v919_v33 }
 0x374   :  { %582 = vmatprep.subr.mxu0 %v948_v3 }
 0x375   :  { %583 = vmatpush1.msra.mxu0 %v955_v4 }
 0x376   :  { %584 = vmatprep.subr.mxu0 %v958_v5 }
 0x377   :  { %585 = vmatpush1.msra.mxu0 %v961_v6 }
 0x378   :  { %586 = vmatprep.subr.mxu0 %v965_v7 }
 0x379   :  { %587 = vmatpush1.msra.mxu0 %v969_v8 }
 0x37a   :  { %588 = vmatprep.subr.mxu0 %v972_v9 }
 0x37b   :  { %589 = vmatpush1.msra.mxu0 %v975_v10 }
 0x37c   :  { %590 = vmatprep.subr.mxu0 %v979_v11 }
 0x37d   :  { %591 = vmatpush1.msra.mxu0 %v983_v12 }
 0x37e   :  { %592 = vmatprep.subr.mxu0 %v986_v13 }
 0x37f   :  { %593 = vmatpush1.msra.mxu0 %v989_v14 }
 0x380   :  { %594 = vmatprep.subr.mxu0 %v993_v15 }
 0x381   :  { %595 = vmatpush1.msra.mxu0 %v997_v16 }
 0x382   :  { %596 = vmatprep.subr.mxu0 %v1000_v17 }
 0x383   :  { %597 = vmatpush1.msra.mxu0 %v1003_v18 }
 0x384   :  { %598 = vmatprep.subr.mxu0 %v1007_v19 }
 0x385   :  { %599 = vmatpush1.msra.mxu0 %v1011_v20 }
 0x386   :  { %600 = vmatprep.subr.mxu0 %v1014_v21 }
 0x387   :  { %601 = vmatpush1.msra.mxu0 %v1017_v22 }
 0x388   :  { %602 = vmatprep.subr.mxu0 %v1021_v23 }
 0x389   :  { %603 = vmatpush1.msra.mxu0 %v1025_v24 }
 0x38a   :  { %604 = vmatprep.subr.mxu0 %v1028_v25 }
 0x38b   :  { %605 = vmatpush1.msra.mxu0 %v1031_v26 }
 0x38c   :  { %606 = vmatprep.subr.mxu0 %v1035_v27 }
 0x38d   :  { %607 = vmatpush1.msra.mxu0 %v1039_v28 }
 0x38e   :  { %608 = vmatprep.subr.mxu0 %v1042_v29 }
 0x38f   :  { %609 = vmatpush1.msra.mxu0 %v1045_v30 }
 0x390   :  { %610 = vmatprep.subr.mxu0 %v1049_v31 }
 0x391   :  { %611 = vmatpush1.msra.mxu0 %v1053_v32 }
 0x392   :  { %655 = vmatprep.subr.mxu0 %v944_v1 }
 0x432   :  { %v429_v53 = vpop.f32.mrf.mxu0 }
 0x433   :  { %v433_v54 = vsub.f32 %v1109_v34, %v429_v53 }
 0x434   :  { %v431_v55 = vpop.f32.mrf.mxu0 }
 0x435   :  { %499 = vmatmul.mubr.f32.vlgmr.msra.gmra.mxu1 %v433_v54 }
 0x436   :  { %510 = vmatpush1.xpose.msra.mxu1 %v946_v2 }
 0x437   :  { %511 = vmatprep.subr.mxu1 %v948_v3 }
 0x43a   :  { %512 = vmatpush1.xpose.msra.mxu1 %v955_v4 }
 0x43b   :  { %513 = vmatprep.subr.mxu1 %v958_v5 }
 0x43e   :  { %514 = vmatpush1.xpose.msra.mxu1 %v961_v6 }
 0x43f   :  { %515 = vmatprep.subr.mxu1 %v965_v7 }
 0x442   :  { %516 = vmatpush1.xpose.msra.mxu1 %v969_v8 }
 0x443   :  { %517 = vmatprep.subr.mxu1 %v972_v9 }
 0x446   :  { %518 = vmatpush1.xpose.msra.mxu1 %v975_v10 }
 0x447   :  { %519 = vmatprep.subr.mxu1 %v979_v11 }
 0x44a   :  { %520 = vmatpush1.xpose.msra.mxu1 %v983_v12 }
 0x44b   :  { %521 = vmatprep.subr.mxu1 %v986_v13 }
 0x44e   :  { %522 = vmatpush1.xpose.msra.mxu1 %v989_v14 }
 0x44f   :  { %523 = vmatprep.subr.mxu1 %v993_v15 }
 0x452   :  { %524 = vmatpush1.xpose.msra.mxu1 %v997_v16 }
 0x453   :  { %525 = vmatprep.subr.mxu1 %v1000_v17 }
 0x456   :  { %526 = vmatpush1.xpose.msra.mxu1 %v1003_v18 }
 0x457   :  { %527 = vmatprep.subr.mxu1 %v1007_v19 }
 0x45a   :  { %528 = vmatpush1.xpose.msra.mxu1 %v1011_v20 }
 0x45b   :  { %529 = vmatprep.subr.mxu1 %v1014_v21 }
 0x45e   :  { %530 = vmatpush1.xpose.msra.mxu1 %v1017_v22 }
 0x45f   :  { %531 = vmatprep.subr.mxu1 %v1021_v23 }
 0x462   :  { %532 = vmatpush1.xpose.msra.mxu1 %v1025_v24 }
 0x463   :  { %533 = vmatprep.subr.mxu1 %v1028_v25 }
 0x466   :  { %534 = vmatpush1.xpose.msra.mxu1 %v1031_v26 }
 0x467   :  { %535 = vmatprep.subr.mxu1 %v1035_v27 }
 0x46a   :  { %536 = vmatpush1.xpose.msra.mxu1 %v1039_v28 }
 0x46b   :  { %537 = vmatprep.subr.mxu1 %v1042_v29 }
 0x46e   :  { %538 = vmatpush1.xpose.msra.mxu1 %v1045_v30 }
 0x46f   :  { %539 = vmatprep.subr.mxu1 %v1049_v31 }
 0x472   :  { %540 = vmatpush1.xpose.msra.mxu1 %v1053_v32 }
 0x473   :  { %726 = vmatprep.subr.mxu1 %v944_v1 }
 0x4f5   :  { %v500_v56 = vpop.f32.mrf.mxu1 }
 0x4f6   :  { %v505_v57 = vmul.f32 0.2, %v500_v56 }
 0x4f7   :  { %v502_v58 = vpop.f32.mrf.mxu1 }
 0x4f8   :  { %v506_v59 = vmul.f32 0.2, %v502_v58  ;;  %v1294_v61 = vadd.f32 %v505_v57, %v1220_v52 }
 0x4fa   :  { %v1291_v60 = vadd.f32 %v506_v59, %v1217_v51 }
 0x4fc   :  { %573 = vmatprep.mubr.f32.mxu1 %v1291_v60 }
 0x4fd   :  { %574 = vmatmul.mubr.f32.vlgmr.msra.gmra.mxu1 %v1294_v61 }
 0x4fe   :  { %727 = vmatpush1.msra.mxu1 %v946_v2  ;;  %790 = vmatprep.mubr.f32.mxu1 %v919_v33 }
 0x4ff   :  { %728 = vmatprep.subr.mxu1 %v948_v3 }
 0x500   :  { %729 = vmatpush1.msra.mxu1 %v955_v4 }
 0x501   :  { %730 = vmatprep.subr.mxu1 %v958_v5 }
 0x502   :  { %731 = vmatpush1.msra.mxu1 %v961_v6 }
 0x503   :  { %732 = vmatprep.subr.mxu1 %v965_v7 }
 0x504   :  { %733 = vmatpush1.msra.mxu1 %v969_v8 }
 0x505   :  { %734 = vmatprep.subr.mxu1 %v972_v9 }
 0x506   :  { %735 = vmatpush1.msra.mxu1 %v975_v10 }
 0x507   :  { %736 = vmatprep.subr.mxu1 %v979_v11 }
 0x508   :  { %737 = vmatpush1.msra.mxu1 %v983_v12 }
 0x509   :  { %738 = vmatprep.subr.mxu1 %v986_v13 }
 0x50a   :  { %739 = vmatpush1.msra.mxu1 %v989_v14 }
 0x50b   :  { %740 = vmatprep.subr.mxu1 %v993_v15 }
 0x50c   :  { %741 = vmatpush1.msra.mxu1 %v997_v16 }
 0x50d   :  { %742 = vmatprep.subr.mxu1 %v1000_v17 }
 0x50e   :  { %743 = vmatpush1.msra.mxu1 %v1003_v18 }
 0x50f   :  { %744 = vmatprep.subr.mxu1 %v1007_v19 }
 0x510   :  { %745 = vmatpush1.msra.mxu1 %v1011_v20 }
 0x511   :  { %746 = vmatprep.subr.mxu1 %v1014_v21 }
 0x512   :  { %747 = vmatpush1.msra.mxu1 %v1017_v22 }
 0x513   :  { %748 = vmatprep.subr.mxu1 %v1021_v23 }
 0x514   :  { %749 = vmatpush1.msra.mxu1 %v1025_v24 }
 0x515   :  { %750 = vmatprep.subr.mxu1 %v1028_v25 }
 0x516   :  { %751 = vmatpush1.msra.mxu1 %v1031_v26 }
 0x517   :  { %752 = vmatprep.subr.mxu1 %v1035_v27 }
 0x518   :  { %753 = vmatpush1.msra.mxu1 %v1039_v28 }
 0x519   :  { %754 = vmatprep.subr.mxu1 %v1042_v29 }
 0x51a   :  { %755 = vmatpush1.msra.mxu1 %v1045_v30 }
 0x51b   :  { %756 = vmatprep.subr.mxu1 %v1049_v31 }
 0x51c   :  { %757 = vmatpush1.msra.mxu1 %v1053_v32 }
 0x5bd   :  { %v575_v62 = vpop.f32.mrf.mxu1 }
 0x5be   :  { %v579_v63 = vsub.f32 %v1109_v34, %v575_v62 }
 0x5bf   :  { %v577_v0 = vpop.f32.mrf.mxu1 }
 0x5c0   :  { %645 = vmatmul.mubr.f32.vlgmr.msra.gmra.mxu0 %v579_v63 }
 0x5c1   :  { %656 = vmatpush1.xpose.msra.mxu0 %v946_v2 }
 0x5c2   :  { %657 = vmatprep.subr.mxu0 %v948_v3 }
 0x5c5   :  { %658 = vmatpush1.xpose.msra.mxu0 %v955_v4 }
 0x5c6   :  { %659 = vmatprep.subr.mxu0 %v958_v5 }
 0x5c9   :  { %660 = vmatpush1.xpose.msra.mxu0 %v961_v6 }
 0x5ca   :  { %661 = vmatprep.subr.mxu0 %v965_v7 }
 0x5cd   :  { %662 = vmatpush1.xpose.msra.mxu0 %v969_v8 }
 0x5ce   :  { %663 = vmatprep.subr.mxu0 %v972_v9 }
 0x5d1   :  { %664 = vmatpush1.xpose.msra.mxu0 %v975_v10  ;;  %v920_v10 = vmov 1966171168  }
 0x5d2   :  { %665 = vmatprep.subr.mxu0 %v979_v11  ;;  %v805_v11 = vunpack.c.l.s4 %v920_v10 }
 0x5d5   :  { %666 = vmatpush1.xpose.msra.mxu0 %v983_v12  ;;  %v807_v12 = vlaneseq }
 0x5d6   :  { %667 = vmatprep.subr.mxu0 %v986_v13 }
 0x5d7   :  { %vm821_vm0 = vcmp.lt.s32.totalorder %v807_v12, 256 }
 0x5d9   :  { %668 = vmatpush1.xpose.msra.mxu0 %v989_v14 }
 0x5da   :  { %669 = vmatprep.subr.mxu0 %v993_v15  ;;  %v806_v15 = vunpack.c.0.s8 %v805_v11 }
 0x5dd   :  { %670 = vmatpush1.xpose.msra.mxu0 %v997_v16  ;;  %v808_v16 = vshrl.u32 %v807_v12, 7 }
 0x5de   :  { %671 = vmatprep.subr.mxu0 %v1000_v17 }
 0x5e1   :  { %672 = vmatpush1.xpose.msra.mxu0 %v1003_v18 }
 0x5e2   :  { %673 = vmatprep.subr.mxu0 %v1007_v19 }
 0x5e5   :  { %674 = vmatpush1.xpose.msra.mxu0 %v1011_v20 }
 0x5e6   :  { %675 = vmatprep.subr.mxu0 %v1014_v21  ;;  %v809_v21 = vsub.s32 %v806_v15, %v808_v16 }
 0x5e9   :  { %676 = vmatpush1.xpose.msra.mxu0 %v1017_v22 }
 0x5ea   :  { %677 = vmatprep.subr.mxu0 %v1021_v23 }
 0x5ed   :  { %678 = vmatpush1.xpose.msra.mxu0 %v1025_v24 }
 0x5ee   :  { %679 = vmatprep.subr.mxu0 %v1028_v25 }
 0x5f1   :  { %680 = vmatpush1.xpose.msra.mxu0 %v1031_v26 }
 0x5f2   :  { %681 = vmatprep.subr.mxu0 %v1035_v27 }
 0x5f5   :  { %682 = vmatpush1.xpose.msra.mxu0 %v1039_v28 }
 0x5f6   :  { %683 = vmatprep.subr.mxu0 %v1042_v29 }
 0x5f9   :  { %684 = vmatpush1.xpose.msra.mxu0 %v1045_v30 }
 0x5fa   :  { %685 = vmatprep.subr.mxu0 %v1049_v31 }
 0x5fd   :  { %686 = vmatpush1.xpose.msra.mxu0 %v1053_v32 }
 0x680   :  { %v646_v1 = vpop.f32.mrf.mxu0 }
 0x681   :  { %v651_v2 = vmul.f32 0.2, %v646_v1 }
 0x682   :  { %v648_v3 = vpop.f32.mrf.mxu0 }
 0x683   :  { %v652_v4 = vmul.f32 0.2, %v648_v3  ;;  %v653_v6 = vadd.f32 %v651_v2, %v1294_v61 }
 0x685   :  { %v654_v5 = vadd.f32 %v652_v4, %v1291_v60 }
 0x687   :  { %719 = vmatprep.mubr.f32.mxu0 %v654_v5 }
 0x688   :  { %720 = vmatmul.mubr.f32.vlgmr.msra.gmra.mxu0 %v653_v6 }
 0x748   :  { %v721_v7 = vpop.f32.mrf.mxu0 }
 0x749   :  { %v725_v8 = vsub.f32 %v1109_v34, %v721_v7 }
 0x74a   :  { %v723_v9 = vpop.f32.mrf.mxu0 }
 0x74b   :  { %791 = vmatmul.mubr.f32.vlgmr.msra.gmra.mxu1 %v725_v8 }
 0x80b   :  { %v792_v13 = vpop.f32.mrf.mxu1 }
 0x80c   :  { %v797_v14 = vmul.f32 0.2, %v792_v13 }
 0x80d   :  { %v794_v17 = vpop.f32.mrf.mxu1 }
 0x80e   :  { %v798_v18 = vmul.f32 0.2, %v794_v17  ;;  %v799_v19 = vadd.f32 %v797_v14, %v653_v6 }
 0x810   :  { %v800_v20 = vadd.f32 %v798_v18, %v654_v5 }
 0x812   :  { %v803_v22 = vcombine.low %v799_v19, %v800_v20 }
 0x814   :  { %v810_v23 = vrot.slane %v803_v22, %v809_v21 }
 0x816   :  { %v817_v24 = vrot.slane %v810_v23, %v809_v21 }
 0x818   :  { %823 = vst.msk [vmem:[#allocation7] sm:$0x3] %vm821_vm0, %v817_v24 }
 0x819   :  { %899 = shalt.err (!%p896_p0)
}
 0x81a   :  { %833 = dma.vmem_to_hbm [thread:$0]  %s831_s1, 32, %s1370_s2, [#allocation4]  }
 0x81b   :  { %912 = dma.done.wait [#allocation4], 32  }
 0x81c   :  { %913 = vsyncadd [#allocation4], 4294967264 }
 0x81d   :  { %837 = vsyncpa [#allocation3], 1 }
 0x81e   :  { %838 = vsyncpa [#allocation6], 1 }
 0x81f   :  { %839 = vsyncpa [#allocation4], 1 }

</bundles_post_ra>
